<compile_context>
chip_gen: v5e
topology: v5e:2x2
jax: 0.10.0
libtpu: 0.0.40
codegen_flags: <defaults>
</compile_context>

<pallas_src>
import jax
import jax.numpy as jnp
from jax import lax
from jax.experimental import pallas as pl
from jax.experimental.pallas import tpu as pltpu


# -----------------------------------------------------------------------------
# Pass 1: fused Q / (V,K) projection over channel-major (C, N) tiles.
# -----------------------------------------------------------------------------
def _proj_kernel(x_ref, wq_ref, bq_ref, wvk_ref, bvk_ref, q_out_ref, kv_out_ref):
    x_bf = x_ref[0].astype(jnp.bfloat16)                                # (C, TK)
    q = jnp.dot(wq_ref[...], x_bf,
                preferred_element_type=jnp.float32) + bq_ref[...]       # (Cq, TK)
    vk = jnp.dot(wvk_ref[...], x_bf,
                 preferred_element_type=jnp.float32) + bvk_ref[...]     # (C+Cq, TK)
    q_out_ref[0] = q.astype(jnp.bfloat16)
    kv_out_ref[0, 0] = vk.astype(jnp.bfloat16)


# -----------------------------------------------------------------------------
# Pass 2: flash attention (online softmax) + gamma residual.
# -----------------------------------------------------------------------------
def _make_attn_kernel(C, Cq, tk, n_valid, kv_resident, need_mask, exp_bf16):
    def kernel(q_ref, kv_ref, x_ref, gamma_ref, out_ref, m_sc, l_sc, acc_sc):
        ki = pl.program_id(2)

        # Per-(batch, query-tile) init. Relies on the ki axis being sequential
        # ("arbitrary") — do not mark it parallel.
        @pl.when(ki == 0)
        def _():
            m_sc[...] = jnp.full_like(m_sc, -jnp.inf)
            l_sc[...] = jnp.zeros_like(l_sc)
            acc_sc[...] = jnp.zeros_like(acc_sc)

        if kv_resident:
            kv = kv_ref[0, ki]          # whole per-batch K/V resident in VMEM
        else:
            kv = kv_ref[0, 0]           # streamed per key tile
        v = kv[:C]                      # (C,  tk) bf16   (offset 0, aligned)
        k = kv[C:]                      # (Cq, tk) bf16   (offset C, 8-aligned)
        q = q_ref[0]                    # (Cq, tq) bf16

        # Energy tile: s[kk, qq] = <k[:, kk], q[:, qq]>  (contraction over Cq).
        # NOTE: no 1/sqrt(Cq) scaling — matches the PyTorch module / reference.
        s = lax.dot_general(k, q, (((0,), (0,)), ((), ())),
                            preferred_element_type=jnp.float32)          # (tk, tq)

        if need_mask:  # padded key columns contribute nothing
            col = ki * tk + lax.broadcasted_iota(jnp.int32, (tk, 1), 0)
            s = jnp.where(col < n_valid, s, -jnp.inf)

        # Online softmax update; l/m/acc stay f32.
        m_prev = m_sc[...]                                               # (1, tq)
        m_new = jnp.maximum(m_prev, jnp.max(s, axis=0, keepdims=True))
        alpha = jnp.exp(m_prev - m_new)
        if exp_bf16:  # v6e/v7x: bf16 EUP roughly doubles exp throughput
            p = jnp.exp((s - m_new).astype(jnp.bfloat16))                # (tk, tq)
            p_sum = jnp.sum(p, axis=0, keepdims=True, dtype=jnp.float32)
            p_mm = p
        else:         # v5e and older: no bf16 EUP/VPU — keep exp in f32
            p = jnp.exp(s - m_new)
            p_sum = jnp.sum(p, axis=0, keepdims=True)
            p_mm = p.astype(jnp.bfloat16)
        l_sc[...] = alpha * l_sc[...] + p_sum
        acc_sc[...] = alpha * acc_sc[...] + jnp.dot(
            v, p_mm, preferred_element_type=jnp.float32)                 # (C, tq)
        m_sc[...] = m_new

        # Finalize on the last key tile: normalize, gamma scale, residual.
        @pl.when(ki == pl.num_programs(2) - 1)
        def _():
            inv_l = pl.reciprocal(l_sc[...], approx=True)                # (1, tq)
            out_ref[0] = gamma_ref[0] * (acc_sc[...] * inv_l) + x_ref[0]

    return kernel


def _default_exp_bf16():
    """bf16 exponentials only help on chips with a bf16 EUP (v6e / v7x)."""
    try:
        kind = jax.devices()[0].device_kind.lower()
    except Exception:
        return True
    return not any(v in kind for v in ("v2", "v3", "v4", "v5"))


def self_attn(x_nchw, params, *, tq=None, tk=None,
              kv_resident_bytes=6 * 1024 * 1024, exp_bf16=None):
    """x_nchw: (B, C, H, W) float32. Returns (B, C, H, W) float32."""
    B, C, H, W = x_nchw.shape
    assert C % 8 == 0, "in_dim must be a multiple of 8 (projects to C // 8 channels)"
    Cq = C // 8
    N = H * W
    N_pad = ((N + 127) // 128) * 128          # lane-align; padded keys are masked

    if exp_bf16 is None:
        exp_bf16 = _default_exp_bf16()

    # Channel-major layout == native NCHW flattening: no wrapper transposes.
    x_bcn = x_nchw.reshape(B, C, N).astype(jnp.float32)
    if N_pad != N:
        x_bcn = jnp.pad(x_bcn, ((0, 0), (0, 0), (0, N_pad - N)))

    def _pick_tile(requested):
        if requested is not None:
            assert N_pad % requested == 0 and (requested % 128 == 0 or requested == N_pad)
            return requested
        for t in (512, 256, 128):             # big tiles keep us MXU-bound
            if N_pad % t == 0:
                return t
        return N_pad                          # unreachable: N_pad % 128 == 0

    auto_tq = tq is None
    tq = _pick_tile(tq)
    tk = _pick_tile(tk)
    if auto_tq:
        # v7x megacore: keep at least 2 blocks across the parallel grid axes.
        while tq > 128 and B * (N_pad // tq) < 2:
            tq //= 2
    n_kt = N_pad // tk

    # Pre-cast weights to bf16 (halved HBM/VMEM, no in-kernel casts); biases f32.
    wq = params["wq"].astype(jnp.bfloat16)                               # (Cq, C)
    bq = params["bq"].reshape(Cq, 1).astype(jnp.float32)
    # Fused value/key projection; V first so both result slices start on
    # 8-sublane-aligned offsets (0 and C) for any C % 8 == 0.
    wvk = jnp.concatenate([params["wv"], params["wk"]], axis=0).astype(jnp.bfloat16)
    bvk = jnp.concatenate([params["bv"].reshape(C, 1),
                           params["bk"].reshape(Cq, 1)], axis=0).astype(jnp.float32)
    gamma = params["gamma"].reshape(1).astype(jnp.float32)

    # ---- Pass 1: project Q / V / K once per element of x. -------------------
    q_all, kv_all = pl.pallas_call(
        _proj_kernel,
        out_shape=(
            jax.ShapeDtypeStruct((B, Cq, N_pad), jnp.bfloat16),
            jax.ShapeDtypeStruct((B, n_kt, C + Cq, tk), jnp.bfloat16),
        ),
        grid_spec=pltpu.PrefetchScalarGridSpec(
            num_scalar_prefetch=0,
            grid=(B, n_kt),
            in_specs=[
                pl.BlockSpec((1, C, tk), lambda b, i: (b, 0, i)),        # x tile
                pl.BlockSpec((Cq, C), lambda b, i: (0, 0)),              # Wq (bf16)
                pl.BlockSpec((Cq, 1), lambda b, i: (0, 0)),              # bq
                pl.BlockSpec((C + Cq, C), lambda b, i: (0, 0)),          # W_vk (bf16)
                pl.BlockSpec((C + Cq, 1), lambda b, i: (0, 0)),          # b_vk
            ],
            out_specs=[
                pl.BlockSpec((1, Cq, tk), lambda b, i: (b, 0, i)),
                pl.BlockSpec((1, 1, C + Cq, tk), lambda b, i: (b, i, 0, 0)),
            ],
        ),
        compiler_params=pltpu.CompilerParams(
            dimension_semantics=("parallel", "parallel"),
            vmem_limit_bytes=48 * 1024 * 1024,
        ),
    )(x_bcn, wq, bq, wvk, bvk)

    # ---- Pass 2: flash attention + gamma residual. ---------------------------
    kv_bytes = (C + Cq) * N_pad * 2
    kv_resident = kv_bytes <= kv_resident_bytes   # whole per-batch K/V in VMEM
    if kv_resident:
        kv_spec = pl.BlockSpec((1, n_kt, C + Cq, tk), lambda b, qi, ki: (b, 0, 0, 0))
    else:
        kv_spec = pl.BlockSpec((1, 1, C + Cq, tk), lambda b, qi, ki: (b, ki, 0, 0))

    kernel = _make_attn_kernel(C, Cq, tk, N, kv_resident, N_pad != N, exp_bf16)

    out_bcn = pl.pallas_call(
        kernel,
        out_shape=jax.ShapeDtypeStruct((B, C, N_pad), jnp.float32),
        grid_spec=pltpu.PrefetchScalarGridSpec(
            num_scalar_prefetch=0,
            grid=(B, N_pad // tq, n_kt),
            in_specs=[
                pl.BlockSpec((1, Cq, tq), lambda b, qi, ki: (b, 0, qi)),  # Q (bf16)
                kv_spec,                                                  # [V;K] (bf16)
                pl.BlockSpec((1, C, tq), lambda b, qi, ki: (b, 0, qi)),   # x residual
                pl.BlockSpec(memory_space=pltpu.MemorySpace.SMEM),        # gamma
            ],
            out_specs=pl.BlockSpec((1, C, tq), lambda b, qi, ki: (b, 0, qi)),
            scratch_shapes=[
                pltpu.VMEM((1, tq), jnp.float32),    # running max m
                pltpu.VMEM((1, tq), jnp.float32),    # running sum l
                pltpu.VMEM((C, tq), jnp.float32),    # output accumulator
            ],
        ),
        compiler_params=pltpu.CompilerParams(
            # ki carries the online-softmax state -> must stay "arbitrary".
            dimension_semantics=("parallel", "parallel", "arbitrary"),
            vmem_limit_bytes=48 * 1024 * 1024,
        ),
    )(q_all, kv_all, x_bcn, gamma)

    if N_pad != N:
        out_bcn = out_bcn[:, :, :N]
    return out_bcn.reshape(B, C, H, W)


def init_params(key, C):
    """Deterministic synthetic init matching the PyTorch module's shapes.
    Conv2d 1x1 weights stored as (out_channels, in_channels)."""
    Cq = C // 8
    k = jax.random.split(key, 6)
    scale = 0.1
    return {
        "wq": scale * jax.random.normal(k[0], (Cq, C), jnp.float32),
        "bq": scale * jax.random.normal(k[1], (Cq,), jnp.float32),
        "wk": scale * jax.random.normal(k[2], (Cq, C), jnp.float32),
        "bk": scale * jax.random.normal(k[3], (Cq,), jnp.float32),
        "wv": scale * jax.random.normal(k[4], (C, C), jnp.float32),
        "bv": scale * jax.random.normal(k[5], (C,), jnp.float32),
        # PyTorch init is gamma=0 (output == input); nonzero value exercises the
        # attention path numerically.
        "gamma": jnp.array([0.5], jnp.float32),
    }


def self_attn_reference(x_nchw, params):
    """Pure-JAX f32 reference mirroring the PyTorch forward exactly."""
    B, C, H, W = x_nchw.shape
    N = H * W
    x_flat = x_nchw.reshape(B, C, N)
    q = jnp.einsum("oc,bcn->bon", params["wq"], x_flat) + params["bq"][None, :, None]
    k = jnp.einsum("oc,bcn->bon", params["wk"], x_flat) + params["bk"][None, :, None]
    v = jnp.einsum("oc,bcn->bon", params["wv"], x_flat) + params["bv"][None, :, None]
    energy = jnp.einsum("bci,bcj->bij", q, k)
    attn = jax.nn.softmax(energy, axis=-1)
    out = jnp.einsum("bcj,bij->bci", v, attn)
    return params["gamma"].reshape(()) * out.reshape(B, C, H, W) + x_nchw


if __name__ == "__main__":
    key = jax.random.PRNGKey(0)
    kx, kp = jax.random.split(key)

    # Test 1: lane-aligned spatial size (N = 256).
    B, C, H, W = 2, 16, 16, 16   # in_dim=16 -> query/key project to 16//8 = 2 channels
    x = jax.random.normal(kx, (B, C, H, W), jnp.float32)
    params = init_params(kp, C)
    out = jax.block_until_ready(self_attn(x, params))
    ref = self_attn_reference(x, params)
    assert out.shape == (B, C, H, W)
    # bf16 Q/K/V + bf16 MXU + approx reciprocal -> loosened tolerance vs f32 ref.
    assert jnp.allclose(out, ref, atol=5e-2, rtol=5e-2), "mismatch (aligned N)"

    # Test 2: N not a multiple of 128 (N = 144 -> padded to 256, padded keys masked).
    H2 = W2 = 12
    x2 = jax.random.normal(jax.random.fold_in(kx, 1), (B, C, H2, W2), jnp.float32)
    out2 = jax.block_until_ready(self_attn(x2, params))
    ref2 = self_attn_reference(x2, params)
    assert out2.shape == (B, C, H2, W2)
    assert jnp.allclose(out2, ref2, atol=5e-2, rtol=5e-2), "mismatch (padded N)"

    print("KERNEL_OK")
</pallas_src>

<mosaic_0001>
module attributes {stable_mosaic.version = 11 : i64} {
  func.func @_proj_kernel(%arg0: i32, %arg1: i32, %arg2: memref<1x16x256xf32, #tpu.memory_space<vmem>>, %arg3: memref<2x16xbf16, #tpu.memory_space<vmem>>, %arg4: memref<2x1xf32, #tpu.memory_space<vmem>>, %arg5: memref<18x16xbf16, #tpu.memory_space<vmem>>, %arg6: memref<18x1xf32, #tpu.memory_space<vmem>>, %arg7: memref<1x2x256xbf16, #tpu.memory_space<vmem>>, %arg8: memref<1x1x18x256xbf16, #tpu.memory_space<vmem>>) attributes {dimension_semantics = [#tpu.dimension_semantics<parallel>, #tpu.dimension_semantics<parallel>], iteration_bounds = array<i64: 2, 1>, scalar_prefetch = 0 : i64, scratch_operands = 0 : i64, tpu.core_type = #tpu.core_type<tc>, window_params = [{transform_indices = @transform_0, window_bounds = array<i64: 1, 16, 256>}, {pipeline_mode = #tpu.pipeline_mode<synchronous>, transform_indices = @transform_1, window_bounds = array<i64: 2, 16>}, {pipeline_mode = #tpu.pipeline_mode<synchronous>, transform_indices = @transform_2, window_bounds = array<i64: 2, 1>}, {pipeline_mode = #tpu.pipeline_mode<synchronous>, transform_indices = @transform_3, window_bounds = array<i64: 18, 16>}, {pipeline_mode = #tpu.pipeline_mode<synchronous>, transform_indices = @transform_4, window_bounds = array<i64: 18, 1>}, {transform_indices = @transform_5, window_bounds = array<i64: 1, 2, 256>}, {transform_indices = @transform_6, window_bounds = array<i64: 1, 1, 18, 256>}]} {
    %c0 = arith.constant 0 : index
    %c0_0 = arith.constant 0 : index
    %c0_1 = arith.constant 0 : index
    %0 = vector.load %arg2[%c0, %c0_0, %c0_1] : memref<1x16x256xf32, #tpu.memory_space<vmem>>, vector<1x16x256xf32>
    %1 = vector.shape_cast %0 : vector<1x16x256xf32> to vector<16x256xf32>
    %2 = arith.truncf %1 : vector<16x256xf32> to vector<16x256xbf16>
    %c0_2 = arith.constant 0 : index
    %c0_3 = arith.constant 0 : index
    %3 = vector.load %arg3[%c0_2, %c0_3] : memref<2x16xbf16, #tpu.memory_space<vmem>>, vector<2x16xbf16>
    %cst = arith.constant dense<0.000000e+00> : vector<2x256xf32>
    %4 = tpu.matmul %3, %2, %cst {dimension_numbers = #tpu.dot_dimension_numbers<[1], [0], [0], [1], [0, 0, 1, 1], [], []>} : vector<2x16xbf16>, vector<16x256xbf16>, vector<2x256xf32> -> vector<2x256xf32>
    %c0_4 = arith.constant 0 : index
    %c0_5 = arith.constant 0 : index
    %5 = vector.load %arg4[%c0_4, %c0_5] : memref<2x1xf32, #tpu.memory_space<vmem>>, vector<2x1xf32>
    %6 = vector.broadcast %5 : vector<2x1xf32> to vector<2x256xf32>
    %7 = arith.addf %4, %6 : vector<2x256xf32>
    %c0_6 = arith.constant 0 : index
    %c0_7 = arith.constant 0 : index
    %8 = vector.load %arg5[%c0_6, %c0_7] : memref<18x16xbf16, #tpu.memory_space<vmem>>, vector<18x16xbf16>
    %cst_8 = arith.constant dense<0.000000e+00> : vector<18x256xf32>
    %9 = tpu.matmul %8, %2, %cst_8 {dimension_numbers = #tpu.dot_dimension_numbers<[1], [0], [0], [1], [0, 0, 1, 1], [], []>} : vector<18x16xbf16>, vector<16x256xbf16>, vector<18x256xf32> -> vector<18x256xf32>
    %c0_9 = arith.constant 0 : index
    %c0_10 = arith.constant 0 : index
    %10 = vector.load %arg6[%c0_9, %c0_10] : memref<18x1xf32, #tpu.memory_space<vmem>>, vector<18x1xf32>
    %11 = vector.broadcast %10 : vector<18x1xf32> to vector<18x256xf32>
    %12 = arith.addf %9, %11 : vector<18x256xf32>
    %13 = arith.truncf %7 : vector<2x256xf32> to vector<2x256xbf16>
    %c0_11 = arith.constant 0 : index
    %c0_12 = arith.constant 0 : index
    %c0_13 = arith.constant 0 : index
    %14 = vector.load %arg7[%c0_11, %c0_12, %c0_13] : memref<1x2x256xbf16, #tpu.memory_space<vmem>>, vector<1x2x256xbf16>
    %15 = vector.shape_cast %14 : vector<1x2x256xbf16> to vector<2x256xbf16>
    %16 = vector.shape_cast %13 : vector<2x256xbf16> to vector<1x2x256xbf16>
    tpu.vector_store %arg7[%c0_11, %c0_12, %c0_13], %16 {strides = array<i32>} : memref<1x2x256xbf16, #tpu.memory_space<vmem>>, vector<1x2x256xbf16>,
    %17 = arith.truncf %12 : vector<18x256xf32> to vector<18x256xbf16>
    %c0_14 = arith.constant 0 : index
    %c0_15 = arith.constant 0 : index
    %c0_16 = arith.constant 0 : index
    %c0_17 = arith.constant 0 : index
    %18 = vector.load %arg8[%c0_14, %c0_15, %c0_16, %c0_17] : memref<1x1x18x256xbf16, #tpu.memory_space<vmem>>, vector<1x1x18x256xbf16>
    %19 = vector.shape_cast %18 : vector<1x1x18x256xbf16> to vector<18x256xbf16>
    %20 = vector.shape_cast %17 : vector<18x256xbf16> to vector<1x1x18x256xbf16>
    tpu.vector_store %arg8[%c0_14, %c0_15, %c0_16, %c0_17], %20 {strides = array<i32>} : memref<1x1x18x256xbf16, #tpu.memory_space<vmem>>, vector<1x1x18x256xbf16>,
    return
  }
  func.func @transform_0(%arg0: i32, %arg1: i32) -> (i32, i32, i32) {
    %c0_i32 = arith.constant 0 : i32
    %c0_i32_0 = arith.constant 0 : i32
    return %arg0, %c0_i32, %arg1 : i32, i32, i32
  }
  func.func @transform_1(%arg0: i32, %arg1: i32) -> (i32, i32) {
    %c0_i32 = arith.constant 0 : i32
    %c0_i32_0 = arith.constant 0 : i32
    %c0_i32_1 = arith.constant 0 : i32
    return %c0_i32, %c0_i32_0 : i32, i32
  }
  func.func @transform_2(%arg0: i32, %arg1: i32) -> (i32, i32) {
    %c0_i32 = arith.constant 0 : i32
    %c0_i32_0 = arith.constant 0 : i32
    %c0_i32_1 = arith.constant 0 : i32
    return %c0_i32, %c0_i32_0 : i32, i32
  }
  func.func @transform_3(%arg0: i32, %arg1: i32) -> (i32, i32) {
    %c0_i32 = arith.constant 0 : i32
    %c0_i32_0 = arith.constant 0 : i32
    %c0_i32_1 = arith.constant 0 : i32
    return %c0_i32, %c0_i32_0 : i32, i32
  }
  func.func @transform_4(%arg0: i32, %arg1: i32) -> (i32, i32) {
    %c0_i32 = arith.constant 0 : i32
    %c0_i32_0 = arith.constant 0 : i32
    %c0_i32_1 = arith.constant 0 : i32
    return %c0_i32, %c0_i32_0 : i32, i32
  }
  func.func @transform_5(%arg0: i32, %arg1: i32) -> (i32, i32, i32) {
    %c0_i32 = arith.constant 0 : i32
    %c0_i32_0 = arith.constant 0 : i32
    return %arg0, %c0_i32, %arg1 : i32, i32, i32
  }
  func.func @transform_6(%arg0: i32, %arg1: i32) -> (i32, i32, i32, i32) {
    %c0_i32 = arith.constant 0 : i32
    %c0_i32_0 = arith.constant 0 : i32
    %c0_i32_1 = arith.constant 0 : i32
    return %arg0, %arg1, %c0_i32, %c0_i32_0 : i32, i32, i32, i32
  }
}

</mosaic_0001>

<bundles_post_ra>
// kernel: tpu_custom_call.1
= control target key start
LH: loop header
LB: loop body
LE: loop exit
PB: predicated region body
PF: predicated region fallthrough
CT: control target
= control target key end

     0   :  { %12 = vsyncpa [#allocation3], 0  ;;  %s1004_s0 = inlined_call_operand.hbm [shape: f32[2,16,256], index: 0, kind: input, shape index: {}]   ;;  %s1005_s1 = inlined_call_operand.vmem [shape: bf16[2,16], index: 1, kind: input, shape index: {}]   ;;  %s1006_s2 = inlined_call_operand.vmem [shape: f32[2,1], index: 2, kind: input, shape index: {}]   ;;  %s1007_s3 = inlined_call_operand.vmem [shape: bf16[18,16], index: 3, kind: input, shape index: {}]   ;;  %s1008_s4 = inlined_call_operand.vmem [shape: f32[18,1], index: 4, kind: input, shape index: {}]   ;;  %s1009_s5 = inlined_call_operand.hbm [shape: bf16[2,2,256], index: 5, kind: output, shape index: {0}]   ;;  %s1010_s6 = inlined_call_operand.vmem [shape: bf16[2,1,18,256], index: 6, kind: output, shape index: {1}]  }
   0x1   :  { %14 = vsyncpa [#allocation3 + $0x1], 0 }
   0x2   :  { %15 = vsyncpa [#allocation4], 0 }
   0x3   :  { %17 = vsyncpa [#allocation4 + $0x1], 0  ;;  %s846_s21 = smov 0   ;;  %s848_s22 = smov 0  }
   0x4   :  { %s850_s23 = smov 0   ;;  %s852_s24 = smov 0  }
   0x5   :  { %s854_s25 = smov 0   ;;  %s856_s26 = smov 0  }
   0x6 LB: > { %s599_s27 = sadd.s32 4294967295, %s806_s26   ;;  %s600_s28 = sadd.s32 4294967294, %s806_s26   ;;  %s806_s26 = sphi %s856_s26, %s23_s26   ;;  %s802_s25 = sphi %s854_s25, %s1022_s25   ;;  %s798_s24 = sphi %s852_s24, %s1021_s24   ;;  %s794_s23 = sphi %s850_s23, %s1020_s23   ;;  %s790_s22 = sphi %s848_s22, %s1019_s22   ;;  %s786_s21 = sphi %s846_s21, %s1018_s21  }
   0x7   : > { %s35_s29 = sadd.s32 1, %s802_s25  ;;  %s44_s30 = sadd.s32 1, %s794_s23 }
   0x8   : > { %p37_p0 = scmp.ge.s32.totalorder %s35_s29, 2  ;;  %p51_p1 = scmp.ne.s32.totalorder %s794_s23, %s790_s22 }
   0x9   : > { %p52_p2 = scmp.eq.s32.totalorder %s806_s26, 0  ;;  %p57_p3 = scmp.ne.s32.totalorder %s790_s22, %s786_s21 }
   0xa   : > { %s1024_s29 = smov (%p37_p0, %s35_s29), 0  ;;  %p58_p5 = scmp.eq.s32.totalorder %s599_s27, 0 }
   0xb   : > { %1012 = sst [smem:[#allocation8_spill]] %s1024_s29  ;;  %p887_p4 = por %p52_p2, %p51_p1 }
   0xc   : > { %s39_s8 = ssub.s32 %s802_s25, %s1024_s29  ;;  %p167_p6 = scmp.eq.s32.totalorder %s599_s27, 1 }
   0xd   : > { %p42_p7 = scmp.eq.s32.totalorder %s39_s8, 0  ;;  %p893_p8 = por %p58_p5, %p57_p3 }
   0xe   : > { %p897_p9 = por %p167_p6, %p51_p1  ;;  %p173_p10 = scmp.eq.s32.totalorder %s600_s28, 1 }
   0xf   : > { %s902_s11 = scalar_select %p42_p7, %s794_s23, %s44_s30  }
  0x10   : > { %p904_p11 = por %p173_p10, %p57_p3  ;;  %p602_p12 = scmp.ge.s32.totalorder %s806_s26, 2 }
  0x11   : > { %p639_p13 = scmp.lt.s32.totalorder %s806_s26, 2  ;;  %s233_s13 = sand.u32 1, %s794_s23  }
  0x12   : > { %s603_s14 = sshll.u32 %s233_s13, 5  ;;  %s624_s15 = sshll.u32 %s802_s25, 5 }
  0x13   : > { %s244_s18 = scalar_lea.hbm %s1004_s0, %s624_s15  ;;  %s237_s19 = scalar_lea.vmem [#allocation2], %s603_s14 }
  0x14   : > { %s247_s20 = sshll.u32 %s237_s19, 4  ;;  %s245_s27 = sshll.u32 %s244_s18, 4  ;;  %s248_s20 = int_to_ptr.vmem [resolvable:$true] %s247_s20  ;;  %s246_s27 = int_to_ptr.hbm [resolvable:$true] %s245_s27 }
  0x15   : > { %p632_p0 = pnand %p639_p13, %p887_p4  ;;  %p606_p1 = scmp.ge.s32.totalorder %s806_s26, 1 }
  0x16   : > { %s234_s28 = scalar_lea.sflag [#allocation3], %s233_s13  ;;  %s808_s30 = smov 256  }
  0x17   : > { %s809_s8 = smov 16   ;;  %p255_p2 = scmp.lt.s32.totalorder %s806_s26, 3 }
  0x18   : > { %634 = dma.hbm_to_vmem [thread:$0]  (!%p632_p0), %s246_s27, 512, %s248_s20, %s234_s28, %s808_s30, %s808_s30, %s809_s8  }
  0x19   : > { %p256_p3 = pnand %p606_p1, %p255_p2 }
  0x1a   : > { %s920_s29 = sand.u32 (!%p256_p3), 1, %s790_s22  }
  0x1b   : > { %259 = sbr.rel (%p256_p3) target bundleno = 196 (0xc4), region = 40  ;;  %s607_s14 = sshll.u32 (!%p256_p3), %s920_s29, 5 }
  0x1c   : > { %s262_s15 = scalar_lea.sflag (!%p256_p3), [#allocation3], %s920_s29  ;;  %s265_s16 = scalar_lea.vmem (!%p256_p3), [#allocation2], %s607_s14 }
  0x20   : > { %777 = dma.done.wait (%p893_p8), %s262_s15, 512  }
  0x21   : > { %779 = vsyncadd (%p893_p8), %s262_s15, 4294966784  ;;  %v810_v0 = vmov 0   ;;  %v316_v1 = vld [vmem:[%s265_s16] sm:$0xff]  ;;  %v318_v2 = vld [vmem:[%s265_s16 + $0x10] sm:$0xff]  ;;  %vm329_vm0 = vcmask 130048   ;;  %p306_p4 = scmp.lt.s32.totalorder %s798_s24, 1 }
  0x22   : > { %692 = vset.pattern.permute.xlu0 %v810_v0  ;;  %693 = vset.pattern.permute.xlu1 %v810_v0  ;;  %v317_v3 = vld [vmem:[%s265_s16 + $0x8] sm:$0xff]  ;;  %v320_v4 = vpack.c.bf16 %v318_v2, %v316_v1  ;;  %v319_v5 = vld [vmem:[%s265_s16 + $0x18] sm:$0xff]  ;;  %v323_v6 = vld [vmem:[%s1006_s2] sm:$0x3]  ;;  %s621_s7 = sshll.u32 %s798_s24, 1  ;;  %s608_s13 = sshll.u32 %s920_s29, 1 }
  0x23   : > { %v321_v7 = vpack.c.bf16 %v319_v5, %v317_v3  ;;  %v625_v8 = vld [vmem:[%s1007_s3] sm:$0xff]  ;;  %326 = vperm.xlu0 %692, %v323_v6   ;;  %v363_v10 = vld [vmem:[%s1008_s4 + $0x8] sm:$0xff]  ;;  %v364_v12 = vld [vmem:[%s1008_s4 + $0x10] sm:$0x3]  ;;  %s1026_s24 = smov (!%p306_p4, %s798_s24), 1  ;;  %s467_s9 = scalar_lea.hbm %s1009_s5, %s621_s7  ;;  %vm433_vm1 = vcmask 1040384  }
  0x24   : > { %401 = vmatpush.bf16.msra.mxu2 %v320_v4  ;;  %340 = vmatpush.bf16.msra.mxu0 %v320_v4  ;;  %v322_v9 = vld [vmem:[%s1005_s1] sm:$0x1]  ;;  %v361_v13 = vld [vmem:[%s1007_s3 + $0x8] sm:$0x1]  ;;  %s292_s19 = scalar_lea.vmem [#allocation5], %s608_s13  ;;  %s471_s27 = sshll.u32 %s467_s9, 4  ;;  %s472_s27 = int_to_ptr.hbm [resolvable:$true] %s471_s27 }
  0x25   : > { %419 = vmatpush.bf16.msra.mxu3 %v321_v7  ;;  %353 = vmatpush.bf16.msra.mxu1 %v321_v7  ;;  %v362_v11 = vld [vmem:[%s1008_s4] sm:$0xff]  ;;  %v385_v14 = vunpack.c.l.b16 %v361_v13  ;;  %s469_s20 = sshll.u32 %s292_s19, 4  ;;  %s626_s28 = smul.u32 24, %s1026_s24  ;;  %s470_s20 = int_to_ptr.vmem [resolvable:$true] %s469_s20 }
  0x26   : > { %372 = vperm.xlu1 %693, %v363_v10   ;;  %s446_s24 = scalar_lea.sflag [#allocation4], %s920_s29  ;;  %s738_s15 = sshra.s32 %s472_s27, 4  ;;  %s739_s15 = int_to_ptr.hbm [resolvable:$true] %s738_s15 }
  0x27   : > { %616 = vmatmul.msk.bf16.vlgmr.msra.gmra.mxu2 %vm329_vm0, %v625_v8  ;;  %610 = vmatmul.msk.bf16.vlgmr.msra.gmra.mxu0 %vm329_vm0, %v322_v9  ;;  %v387_v15 = vpack.c.b16 %v385_v14, %v385_v14  ;;  %s965_s14 = scalar_lea.vmem %s1010_s6, %s626_s28  ;;  %s740_s16 = scalar_lea.hbm %s739_s15, 2 }
  0x28   : > { %618 = vmatmul.msk.bf16.vlgmr.msra.gmra.mxu3 %vm329_vm0, %v625_v8  ;;  %611 = vmatmul.msk.bf16.vlgmr.msra.gmra.mxu1 %vm329_vm0, %v322_v9  ;;  %p741_p5 = scmp.ne.s32.totalorder %s739_s15, %s740_s16  ;;  %s744_s17 = scalar_lea.hbm %s1009_s5, 4 }
  0x29   : > { %p745_p8 = scmp.lt.s32.totalorder %s739_s15, %s1009_s5  ;;  %p746_p10 = scmp.lt.s32.totalorder %s744_s17, %s740_s16 }
  0x2a   : > { %p742_p6 = pnand %p741_p5, %p897_p9 }
  0x2b   : > { %367 = vperm.xlu0 %692, %v362_v11   ;;  %p747_p13 = por %p746_p10, %p745_p8 }
  0x2c   : > { %p743_p7 = pneg %p742_p6 }
  0x2e   : > { %377 = vperm.xlu1 %693, %v364_v12   ;;  %p748_p0 = pnand %p747_p13, %p743_p7 }
  0x37   : > { %617 = vmatmul.msk.bf16.gmra.mxu2 %vm329_vm0, %v387_v15 }
  0x38   : > { %619 = vmatmul.msk.bf16.gmra.mxu3 %vm329_vm0, %v387_v15 }
  0x95   : > { %v327_v16 = vpop.permute.xlu0 %326 }
  0x9d   : > { %v368_v21 = vpop.permute.xlu0 %367 }
  0xa4   : > { %v342_v17 = vpop.f32.mrf.mxu0 }
  0xa5   : > { %v343_v18 = vadd.f32 %v342_v17, %v327_v16  ;;  %v355_v19 = vpop.f32.mrf.mxu1 }
  0xa6   : > { %v356_v20 = vadd.f32 %v355_v19, %v327_v16 }
  0xa8   : > { %v430_v22 = vpack.c.bf16 %v356_v20, %v343_v18 }
  0xaa   : > { %v403_v23 = vpop.f32.mrf.mxu2  ;;  %v432_v24 = vrot.slane %v430_v22, 3 }
  0xab   : > { %v404_v25 = vadd.f32 %v403_v23, %v368_v21  ;;  %v421_v26 = vpop.f32.mrf.mxu3 }
  0xac   : > { %v422_v27 = vadd.f32 %v421_v26, %v368_v21  ;;  %v436_v28 = vsel %vm433_vm1, %v430_v22, %v432_v24  ;;  %v344_v29 = vpop.f32.mrf.mxu0 }
  0xad   : > { %v357_v30 = vpop.f32.mrf.mxu1  ;;  %438 = vst [vmem:[%s292_s19] sm:$0x3] %v436_v28 }
  0xae   : > { %v439_v31 = vpack.c.bf16 %v422_v27, %v404_v25 }
  0xaf   : > { %751 = shalt.err (!%p748_p0)
}
  0xb0   : > { %629 = dma.vmem_to_hbm [thread:$0]  (%p897_p9), %s470_s20, 32, %s472_s27, %s446_s24   ;;  %442 = vst [vmem:[%s965_s14] sm:$0xff] %v439_v31  ;;  %v373_v32 = vpop.permute.xlu1 %372 }
  0xb2   : > { %v405_v33 = vpop.f32.mrf.mxu2 }
  0xb3   : > { %v406_v34 = vadd.f32 %v405_v33, %v373_v32  ;;  %v423_v35 = vpop.f32.mrf.mxu3 }
  0xb4   : > { %v424_v36 = vadd.f32 %v423_v35, %v373_v32 }
  0xb6   : > { %v440_v37 = vpack.c.bf16 %v424_v36, %v406_v34 }
  0xb8   : > { %443 = vst [vmem:[%s965_s14 + $0x8] sm:$0xff] %v440_v37  ;;  %v378_v38 = vpop.permute.xlu1 %377 }
  0xba   : > { %v408_v39 = vpop.f32.mrf.mxu2 }
  0xbb   : > { %v409_v40 = vadd.f32 %v408_v39, %v378_v38  ;;  %v426_v41 = vpop.f32.mrf.mxu3 }
  0xbc   : > { %v427_v42 = vadd.f32 %v426_v41, %v378_v38 }
  0xbe   : > { %v441_v43 = vpack.c.bf16 %v427_v42, %v409_v40 }
  0xc0   : > { %444 = vst [vmem:[%s965_s14 + $0x10] sm:$0x11] %v441_v43 }
  0xc2   : > { %v410_v44 = vpop.f32.mrf.mxu2 }
  0xc3   : > { %v428_v45 = vpop.f32.mrf.mxu3 }
  0xc4 PF: > { %s486_s29 = sand.u32 1, %s786_s21   ;;  %p636_p9 = pnand %p602_p12, %p904_p11 }
  0xc5   : > { %s487_s10 = scalar_lea.sflag [#allocation4], %s486_s29 }
  0xc6   : > { %p637_p1 = pneg %p636_p9 }
  0xc8   : > { %781 = dma.done.wait (%p637_p1), %s487_s10, 32  }
  0xc9   : > { %783 = vsyncadd (%p637_p1), %s487_s10, 4294967264  ;;  %s23_s26 = sadd.s32 1, %s806_s26   ;;  %s1017_s19 = sld [smem:[#allocation8_spill]] }
  0xca   : > { %p20_p2 = scmp.ge.s32.totalorder %s23_s26, 4   ;;  %s1018_s21 = smov %s790_s22 }
  0xcb   : > { %s1019_s22 = smov %s794_s23  ;;  %s1020_s23 = smov %s902_s11 }
  0xcc   : > { %s1021_s24 = smov %s802_s25  ;;  %22 = sbr.rel (!%p20_p2) target bundleno = 6 (0x6), region = 97 }
  0xcf   : > { %s1022_s25 = smov %s1017_s19 }
  0xd1   :  { %505 = vsyncpa [#allocation3], 1 }
  0xd2   :  { %507 = vsyncpa [#allocation3 + $0x1], 1 }
  0xd3   :  { %508 = vsyncpa [#allocation4], 1 }
  0xd4   :  { %510 = vsyncpa [#allocation4 + $0x1], 1 }

</bundles_post_ra>
